<compile_context>
chip_gen: v6e
topology: v6e:2x2x1
jax: 0.10.0
libtpu: 0.0.40
codegen_flags: <defaults>
</compile_context>

<pallas_src>
import jax
import jax.numpy as jnp
from jax import lax
from jax.experimental import pallas as pl
from jax.experimental.pallas import tpu as pltpu


_N_ACC = 4            # independent running-max accumulators on the resident path (ILP)
_ROWS_PER_STEP = 16   # words gathered per grid step on the chunked gather path
_N_SLOTS = 3          # manual pipeline depth (buffer slots) on the chunked gather path
_SINGLE_SHOT_MAX = 64 # word lists up to this size use the single-shot gather path


def _round_up(x, m):
    return ((x + m - 1) // m) * m


def _vmem_capacity_bytes():
    """Generation-aware VMEM capacity (v5e/v6e: 128 MiB, v7x: 64 MiB)."""
    try:
        cap = int(pltpu.get_tpu_info().vmem_capacity_bytes)
        if cap > 0:
            return cap
    except Exception:
        pass
    return 64 * 1024 * 1024  # conservative default (v7x per-core VMEM)


# ---------------------------------------------------------------------------
# Path a: table resident in VMEM (single contiguous DMA), direct S-row gather.
# ---------------------------------------------------------------------------
def _resident_kernel(words_ref, emb_hbm, out_ref, tbl, sem):
    # words_ref: SMEM int32 [S_pad]   (scalar prefetch, S_pad % _N_ACC == 0)
    # emb_hbm  : HBM ref [V, Dp]      (memory_space=pl.ANY)
    # out_ref  : VMEM [1, Dp]
    # tbl      : VMEM [V, Dp]         single-buffered resident copy of the table
    # sem      : DMA semaphore
    cp = pltpu.make_async_copy(emb_hbm, tbl, sem)
    cp.start()
    cp.wait()

    S = words_ref.shape[0]

    def row(idx):
        # Dynamic-slice gather of one embedding row from the VMEM-resident table.
        return tbl[pl.ds(words_ref[idx], 1), :]

    def body(i, accs):
        base = i * _N_ACC
        return tuple(jnp.maximum(accs[r], row(base + r)) for r in range(_N_ACC))

    # 4 interleaved accumulators for ILP; duplicates from padding are free (max is
    # idempotent).  O(S * Dp) work instead of the old O(S * V) mask build.
    accs = lax.fori_loop(1, S // _N_ACC, body,
                         tuple(row(r) for r in range(_N_ACC)))

    acc = accs[0]
    for r in range(1, _N_ACC):
        acc = jnp.maximum(acc, accs[r])
    out_ref[...] = acc.astype(out_ref.dtype)


def _text_to_vector_resident(words, emb_table):
    V, Dp = emb_table.shape
    S = int(words.shape[0])
    S_pad = _round_up(S, _N_ACC)
    if S_pad != S:
        words = jnp.pad(words, (0, S_pad - S), mode="edge")

    table_bytes = int(V * Dp * emb_table.dtype.itemsize)
    vmem_limit = min(table_bytes + (16 << 20), _vmem_capacity_bytes())

    return pl.pallas_call(
        _resident_kernel,
        out_shape=jax.ShapeDtypeStruct((1, Dp), emb_table.dtype),
        grid_spec=pltpu.PrefetchScalarGridSpec(
            num_scalar_prefetch=1,                       # `words` lands in SMEM
            grid=(1,),
            in_specs=[pl.BlockSpec(memory_space=pl.ANY)],  # table stays in HBM; manual DMA
            out_specs=pl.BlockSpec((1, Dp), lambda i, words: (0, 0)),
            scratch_shapes=[
                pltpu.VMEM((V, Dp), emb_table.dtype),
                pltpu.SemaphoreType.DMA,
            ],
        ),
        compiler_params=pltpu.CompilerParams(
            dimension_semantics=("arbitrary",),
            vmem_limit_bytes=vmem_limit),
    )(words, emb_table)


# ---------------------------------------------------------------------------
# Path b: single-shot gather (short word lists) -- all row DMAs in flight at once.
# ---------------------------------------------------------------------------
def _single_shot_gather_kernel(words_ref, emb_hbm, out_ref, buf, sem):
    # words_ref: SMEM int32 [S_pad]
    # emb_hbm  : HBM ref [V, Dp]
    # out_ref  : VMEM [1, Dp]
    # buf      : VMEM [S_pad, Dp]
    # sem      : DMA semaphores [S_pad]
    S_pad = buf.shape[0]
    for r in range(S_pad):
        pltpu.make_async_copy(emb_hbm.at[words_ref[r]], buf.at[r], sem.at[r]).start()
    for r in range(S_pad):
        # Identical descriptor (same src/dst/sem) as the start() above.
        pltpu.make_async_copy(emb_hbm.at[words_ref[r]], buf.at[r], sem.at[r]).wait()
    out_ref[...] = jnp.max(buf[...], axis=0, keepdims=True).astype(out_ref.dtype)


def _text_to_vector_gather_single(words, emb_table):
    V, Dp = emb_table.shape
    S = int(words.shape[0])
    S_pad = _round_up(S, 8)
    if S_pad != S:
        words = jnp.pad(words, (0, S_pad - S), mode="edge")

    return pl.pallas_call(
        _single_shot_gather_kernel,
        out_shape=jax.ShapeDtypeStruct((1, Dp), emb_table.dtype),
        grid_spec=pltpu.PrefetchScalarGridSpec(
            num_scalar_prefetch=1,
            grid=(1,),
            in_specs=[pl.BlockSpec(memory_space=pl.ANY)],
            out_specs=pl.BlockSpec((1, Dp), lambda i, words: (0, 0)),
            scratch_shapes=[
                pltpu.VMEM((S_pad, Dp), emb_table.dtype),
                pltpu.SemaphoreType.DMA((S_pad,)),
            ],
        ),
        compiler_params=pltpu.CompilerParams(
            dimension_semantics=("arbitrary",)),
    )(words, emb_table)


# ---------------------------------------------------------------------------
# Path c: chunked gather (long word lists) -- 16 rows/step, triple-buffered pipeline.
# ---------------------------------------------------------------------------
def _chunked_gather_kernel(words_ref, emb_hbm, out_ref, buf, sem, acc):
    # words_ref: SMEM int32 [n_chunks * 16]  (padded with repeats)
    # emb_hbm  : HBM ref [V, Dp]
    # out_ref  : VMEM [1, Dp]
    # buf      : VMEM [3, 16, Dp]            triple-buffered row fetches
    # sem      : DMA semaphores [3, 16]
    # acc      : VMEM [16, Dp]               running per-sublane max (table dtype)
    i = pl.program_id(0)
    n = pl.num_programs(0)
    R = _ROWS_PER_STEP

    def fetch(chunk, slot):
        for r in range(R):
            w = words_ref[chunk * R + r]
            pltpu.make_async_copy(
                emb_hbm.at[w], buf.at[slot, r], sem.at[slot, r]).start()

    @pl.when(i == 0)
    def _():
        acc[...] = jnp.full_like(acc, -jnp.inf)
        fetch(0, 0)

    @pl.when(jnp.logical_and(i == 0, 1 < n))
    def _():
        fetch(1, 1)

    # Keep two chunks in flight: prefetch chunk i+2 into slot (i+2) % 3.
    @pl.when(i + 2 < n)
    def _():
        fetch(i + 2, (i + 2) % _N_SLOTS)

    slot = i % _N_SLOTS
    for r in range(R):
        w = words_ref[i * R + r]
        # Same descriptor shape/src as the matching start().
        pltpu.make_async_copy(
            emb_hbm.at[w], buf.at[slot, r], sem.at[slot, r]).wait()

    acc[...] = jnp.maximum(acc[...], buf[slot])

    @pl.when(i == n - 1)
    def _():
        out_ref[...] = jnp.max(acc[...], axis=0, keepdims=True).astype(out_ref.dtype)


def _text_to_vector_gather_chunked(words, emb_table):
    V, Dp = emb_table.shape
    S = int(words.shape[0])
    R = _ROWS_PER_STEP
    n_chunks = -(-S // R)
    S_pad = n_chunks * R
    if S_pad != S:
        words = jnp.pad(words, (0, S_pad - S), mode="edge")

    return pl.pallas_call(
        _chunked_gather_kernel,
        out_shape=jax.ShapeDtypeStruct((1, Dp), emb_table.dtype),
        grid_spec=pltpu.PrefetchScalarGridSpec(
            num_scalar_prefetch=1,
            grid=(n_chunks,),
            in_specs=[pl.BlockSpec(memory_space=pl.ANY)],
            out_specs=pl.BlockSpec((1, Dp), lambda i, words: (0, 0)),
            scratch_shapes=[
                pltpu.VMEM((_N_SLOTS, R, Dp), emb_table.dtype),
                pltpu.SemaphoreType.DMA((_N_SLOTS, R)),
                pltpu.VMEM((R, Dp), emb_table.dtype),   # max is exact in table dtype
            ],
        ),
        compiler_params=pltpu.CompilerParams(
            dimension_semantics=("arbitrary",)),
    )(words, emb_table)


# ---------------------------------------------------------------------------
# Wrapper (mirrors TextToVector.forward, inference mode)
# ---------------------------------------------------------------------------
def text_to_vector(words, emb_table, *, force_path=None,
                   resident_vmem_fraction=0.4, gather_crossover_ratio=8):
    """words: int array [S] of token ids; emb_table: float [V, D]. Returns (D,).

    gather_crossover_ratio: use the VMEM-resident-table path only when
    S * ratio >= V (the resident path streams the whole table from HBM, so it
    only pays off when the word list covers a sizeable fraction of the vocab).
    Raise it on v5e (lower HBM bandwidth) to bias further toward row gathers.
    """
    words = jnp.asarray(words, dtype=jnp.int32)
    emb_table = jnp.asarray(emb_table)
    S = int(words.shape[0])
    V, D = emb_table.shape

    if S == 0:
        # Mirrors the PyTorch fallback quirk: torch.zeros([1, 200]) (2-D, fixed 200,
        # shape-inconsistent with the non-empty (D,) result whenever D != 200).
        return jnp.zeros((1, 200), dtype=emb_table.dtype)

    # Clamp ids so a bad token can never trigger an OOB row DMA / dynamic load.
    words = jnp.clip(words, 0, V - 1)

    # Lane-dense padding of the embedding dim (no-op when already a mult of 128).
    Dp = _round_up(D, 128)
    if Dp != D:
        emb_table = jnp.pad(emb_table, ((0, 0), (0, Dp - D)))

    table_bytes = int(V * Dp * emb_table.dtype.itemsize)
    vmem_budget = int(resident_vmem_fraction * _vmem_capacity_bytes())

    if force_path is None:
        if table_bytes <= vmem_budget and S * gather_crossover_ratio >= V:
            path = "resident"
        elif S <= _SINGLE_SHOT_MAX:
            path = "gather_single"
        else:
            path = "gather_chunked"
    else:
        path = force_path

    if path == "resident":
        out = _text_to_vector_resident(words, emb_table)
    elif path == "gather_single":
        out = _text_to_vector_gather_single(words, emb_table)
    elif path == "gather_chunked":
        out = _text_to_vector_gather_chunked(words, emb_table)
    else:
        raise ValueError(f"unknown path {path!r}")

    # PyTorch returns a 1-D tensor of shape (embedding_dim,)
    return out.reshape(Dp)[:D]


if __name__ == "__main__":
    key = jax.random.PRNGKey(0)
    k_emb, k_words, k_words2 = jax.random.split(key, 3)

    V = 32    # num_embeddings (vocab size of the pretrained vectors)
    D = 200   # embedding_dim (not lane-aligned -> exercises the Dp padding)
    S = 8     # number of words in the input sentence

    emb_table = jax.random.normal(k_emb, (V, D), dtype=jnp.float32)
    words = jax.random.randint(k_words, (S,), 0, V, dtype=jnp.int32)
    ref = jnp.max(emb_table[words], axis=0)

    # 1) Default path selection (tiny table, S*8 >= V -> VMEM-resident-table path).
    out = jax.block_until_ready(text_to_vector(words, emb_table))
    assert out.shape == (D,)
    assert jnp.allclose(out, ref, atol=1e-6), "resident path mismatch"

    # 2) Single-shot gather path (all row DMAs concurrently in one grid step).
    out_single = jax.block_until_ready(
        text_to_vector(words, emb_table, force_path="gather_single"))
    assert out_single.shape == (D,)
    assert jnp.allclose(out_single, ref, atol=1e-6), "single-shot gather mismatch"

    # 3) Chunked (triple-buffered) gather path with a long, ragged word list.
    S_long = 100
    words_long = jax.random.randint(k_words2, (S_long,), 0, V, dtype=jnp.int32)
    ref_long = jnp.max(emb_table[words_long], axis=0)
    out_long = jax.block_until_ready(
        text_to_vector(words_long, emb_table, force_path="gather_chunked"))
    assert jnp.allclose(out_long, ref_long, atol=1e-6), "chunked gather mismatch"

    # 4) Chunked path degenerate case (single chunk, ragged S).
    words5 = words[:5]
    ref5 = jnp.max(emb_table[words5], axis=0)
    out5 = jax.block_until_ready(
        text_to_vector(words5, emb_table, force_path="gather_chunked"))
    assert jnp.allclose(out5, ref5, atol=1e-6), "single-chunk gather mismatch"

    print("KERNEL_OK")
</pallas_src>

<mosaic_0001>
module attributes {stable_mosaic.version = 11 : i64} {
  func.func @_resident_kernel(%arg0: i32, %arg1: memref<8xi32, #tpu.memory_space<smem>>, %arg2: memref<32x256xf32, #tpu.memory_space<any>>, %arg3: memref<1x256xf32, #tpu.memory_space<vmem>>, %arg4: memref<32x256xf32, #tpu.memory_space<vmem>>, %arg5: memref<!tpu.dma_semaphore, #tpu.memory_space<semaphore_mem>>) attributes {dimension_semantics = [#tpu.dimension_semantics<arbitrary>], iteration_bounds = array<i64: 1>, scalar_prefetch = 1 : i64, scratch_operands = 2 : i64, tpu.core_type = #tpu.core_type<tc>, window_params = [{}, {pipeline_mode = #tpu.pipeline_mode<synchronous>, transform_indices = @transform_1, window_bounds = array<i64: 1, 256>}]} {
    tpu.enqueue_dma source(%arg2 : memref<32x256xf32, #tpu.memory_space<any>>) target(%arg4 : memref<32x256xf32, #tpu.memory_space<vmem>>) target_semaphore(%arg5 : memref<!tpu.dma_semaphore, #tpu.memory_space<semaphore_mem>>)
    tpu.wait_dma2 semaphore(%arg5 : memref<!tpu.dma_semaphore, #tpu.memory_space<semaphore_mem>>) src(%arg2 : memref<32x256xf32, #tpu.memory_space<any>>) dst(%arg4 : memref<32x256xf32, #tpu.memory_space<vmem>>)
    %c0 = arith.constant 0 : index
    %0 = memref.load %arg1[%c0] : memref<8xi32, #tpu.memory_space<smem>>
    %1 = arith.index_cast %0 : i32 to index
    %c0_0 = arith.constant 0 : index
    %2 = vector.load %arg4[%1, %c0_0] : memref<32x256xf32, #tpu.memory_space<vmem>>, vector<1x256xf32>
    %c1 = arith.constant 1 : index
    %3 = memref.load %arg1[%c1] : memref<8xi32, #tpu.memory_space<smem>>
    %4 = arith.index_cast %3 : i32 to index
    %c0_1 = arith.constant 0 : index
    %5 = vector.load %arg4[%4, %c0_1] : memref<32x256xf32, #tpu.memory_space<vmem>>, vector<1x256xf32>
    %c2 = arith.constant 2 : index
    %6 = memref.load %arg1[%c2] : memref<8xi32, #tpu.memory_space<smem>>
    %7 = arith.index_cast %6 : i32 to index
    %c0_2 = arith.constant 0 : index
    %8 = vector.load %arg4[%7, %c0_2] : memref<32x256xf32, #tpu.memory_space<vmem>>, vector<1x256xf32>
    %c3 = arith.constant 3 : index
    %9 = memref.load %arg1[%c3] : memref<8xi32, #tpu.memory_space<smem>>
    %10 = arith.index_cast %9 : i32 to index
    %c0_3 = arith.constant 0 : index
    %11 = vector.load %arg4[%10, %c0_3] : memref<32x256xf32, #tpu.memory_space<vmem>>, vector<1x256xf32>
    %c1_i32 = arith.constant 1 : i32
    %c4_i32 = arith.constant 4 : i32
    %12 = arith.muli %c1_i32, %c4_i32 : i32
    %c0_i32 = arith.constant 0 : i32
    %13 = arith.addi %12, %c0_i32 : i32
    %14 = arith.index_cast %13 : i32 to index
    %15 = memref.load %arg1[%14] : memref<8xi32, #tpu.memory_space<smem>>
    %16 = arith.index_cast %15 : i32 to index
    %c0_4 = arith.constant 0 : index
    %17 = vector.load %arg4[%16, %c0_4] : memref<32x256xf32, #tpu.memory_space<vmem>>, vector<1x256xf32>
    %18 = arith.maximumf %2, %17 : vector<1x256xf32>
    %c1_i32_5 = arith.constant 1 : i32
    %19 = arith.addi %12, %c1_i32_5 : i32
    %20 = arith.index_cast %19 : i32 to index
    %21 = memref.load %arg1[%20] : memref<8xi32, #tpu.memory_space<smem>>
    %22 = arith.index_cast %21 : i32 to index
    %c0_6 = arith.constant 0 : index
    %23 = vector.load %arg4[%22, %c0_6] : memref<32x256xf32, #tpu.memory_space<vmem>>, vector<1x256xf32>
    %24 = arith.maximumf %5, %23 : vector<1x256xf32>
    %c2_i32 = arith.constant 2 : i32
    %25 = arith.addi %12, %c2_i32 : i32
    %26 = arith.index_cast %25 : i32 to index
    %27 = memref.load %arg1[%26] : memref<8xi32, #tpu.memory_space<smem>>
    %28 = arith.index_cast %27 : i32 to index
    %c0_7 = arith.constant 0 : index
    %29 = vector.load %arg4[%28, %c0_7] : memref<32x256xf32, #tpu.memory_space<vmem>>, vector<1x256xf32>
    %30 = arith.maximumf %8, %29 : vector<1x256xf32>
    %c3_i32 = arith.constant 3 : i32
    %31 = arith.addi %12, %c3_i32 : i32
    %32 = arith.index_cast %31 : i32 to index
    %33 = memref.load %arg1[%32] : memref<8xi32, #tpu.memory_space<smem>>
    %34 = arith.index_cast %33 : i32 to index
    %c0_8 = arith.constant 0 : index
    %35 = vector.load %arg4[%34, %c0_8] : memref<32x256xf32, #tpu.memory_space<vmem>>, vector<1x256xf32>
    %36 = arith.maximumf %11, %35 : vector<1x256xf32>
    %c1_i32_9 = arith.constant 1 : i32
    %37 = arith.maximumf %18, %24 : vector<1x256xf32>
    %38 = arith.maximumf %37, %30 : vector<1x256xf32>
    %39 = arith.maximumf %38, %36 : vector<1x256xf32>
    %c0_10 = arith.constant 0 : index
    %c0_11 = arith.constant 0 : index
    %40 = vector.load %arg3[%c0_10, %c0_11] : memref<1x256xf32, #tpu.memory_space<vmem>>, vector<1x256xf32>
    tpu.vector_store %arg3[%c0_10, %c0_11], %39 {strides = array<i32>} : memref<1x256xf32, #tpu.memory_space<vmem>>, vector<1x256xf32>,
    return
  }
  func.func @transform_1(%arg0: i32, %arg1: memref<8xi32, #tpu.memory_space<smem>>) -> (i32, i32) {
    %c0_i32 = arith.constant 0 : i32
    %c0_i32_0 = arith.constant 0 : i32
    %c0_i32_1 = arith.constant 0 : i32
    return %c0_i32, %c0_i32_0 : i32, i32
  }
}

</mosaic_0001>

<bundles_post_ra>
// kernel: tpu_custom_call.1
= control target key start
LH: loop header
LB: loop body
LE: loop exit
PB: predicated region body
PF: predicated region fallthrough
CT: control target
= control target key end

     0   :  { %s252_s9 = smov [#allocation5]   ;;  %s287_s0 = inlined_call_operand.hbm [shape: s32[8], index: 0, kind: input, shape index: {}]   ;;  %s288_s1 = inlined_call_operand.hbm [shape: f32[32,256], index: 1, kind: input, shape index: {}]   ;;  %s289_s2 = inlined_call_operand.hbm [shape: f32[1,256], index: 2, kind: output, shape index: {}]  }
   0x1   :  { %8 = dma.hbm_to_smem %s287_s0, 16, %s252_s9, [#allocation4] }
   0x2   :  { %246 = dma.done.wait [#allocation4], 16 }
   0x3   :  { %247 = vsyncadd [#allocation4], 4294967280 }
   0x4   :  { %10 = sfence }
   0x5   :  { %11 = vsyncpa [#allocation7], 0  ;;  %s253_s12 = smov [#allocation2]  }
   0x6   :  { %s19_s13 = sshll.u32 %s253_s12, 4  ;;  %s20_s13 = int_to_ptr.vmem [resolvable:$true] %s19_s13 }
   0x7   :  { %s214_s14 = scalar_lea.vmem %s20_s13, 1024  ;;  %p219_p1 = scmp.lt.s32.totalorder %s20_s13, %s20_s13 }
   0x8   :  { %p215_p0 = scmp.ne.s32.totalorder %s20_s13, %s214_s14  ;;  %p220_p2 = scmp.lt.s32.totalorder %s214_s14, %s214_s14 }
   0xa   :  { %p221_p3 = por %p220_p2, %p219_p1 }
   0xc   :  { %p222_p4 = pnand %p221_p3, %p215_p0 }
   0xe   :  { %225 = shalt.err (!%p222_p4)  }
   0xf   :  { %22 = dma.hbm_to_vmem [thread:$0]  %s288_s1, 1024, %s20_s13, [#allocation3] }
  0x10   :  { %248 = dma.done.wait [#allocation3], 1024 }
  0x11   :  { %249 = vsyncadd [#allocation3], 4294966272  ;;  %s27_s0 = sld [smem:[#allocation5]]  ;;  %v114_v10 = vlaneseq }
  0x12   :  { %s165_s17 = sld [smem:[#allocation5 + $0x1]] }
  0x13   :  { %s276_s18 = sld [smem:[#allocation5 + $0x2]]  ;;  %vm116_vm0 = vcmp.lt.s32.totalorder %v114_v10, 256 }
  0x14   :  { %s278_s19 = sld [smem:[#allocation5 + $0x3]] }
  0x15   :  { %s174_s20 = sld [smem:[#allocation5 + $0x4]] }
  0x16   :  { %s177_s26 = sld [smem:[#allocation5 + $0x5]] }
  0x17   :  { %s28_s21 = sshra.s32 %s27_s0, 3  ;;  %s31_s22 = sand.u32 7, %s27_s0 }
  0x18   :  { %s187_s23 = sshll.u32 %s28_s21, 4  ;;  %s38_s24 = sshra.s32 %s165_s17, 3 }
  0x19   :  { %s41_s25 = sand.u32 7, %s165_s17  ;;  %s34_s1 = sadd.s32 %s187_s23, %s31_s22 }
  0x1a   :  { %s188_s27 = sshll.u32 %s38_s24, 4  ;;  %s48_s29 = sshra.s32 %s276_s18, 3 }
  0x1b   :  { %s44_s28 = sadd.s32 %s188_s27, %s41_s25  ;;  %s58_s30 = sshra.s32 %s278_s19, 3 }
  0x1c   :  { %s51_s3 = sand.u32 7, %s276_s18  ;;  %s189_s4 = sshll.u32 %s48_s29, 4 }
  0x1d   :  { %s61_s5 = sand.u32 7, %s278_s19  ;;  %s68_s6 = sshra.s32 %s174_s20, 3 }
  0x1e   :  { %s190_s7 = sshll.u32 %s58_s30, 4  ;;  %s71_s8 = sand.u32 7, %s174_s20 }
  0x1f   :  { %s191_s9 = sshll.u32 %s68_s6, 4  ;;  %s79_s10 = sshra.s32 %s177_s26, 3 }
  0x20   :  { %s74_s11 = sadd.s32 %s191_s9, %s71_s8  ;;  %s82_s12 = sand.u32 7, %s177_s26 }
  0x21   :  { %s192_s13 = sshll.u32 %s79_s10, 4  ;;  %s35_s14 = scalar_lea.vmem [#allocation2], %s34_s1 }
  0x22   :  { %v36_v0 = vld [vmem:[%s35_s14] ss:$8 sm:$0x3]  ;;  %s85_s15 = sadd.s32 %s192_s13, %s82_s12  ;;  %s180_s16 = sld [smem:[#allocation5 + $0x6]] }
  0x23   :  { %s45_s0 = scalar_lea.vmem [#allocation2], %s44_s28  ;;  %s183_s17 = sld [smem:[#allocation5 + $0x7]] }
  0x24   :  { %v46_v1 = vld [vmem:[%s45_s0] ss:$8 sm:$0x3]  ;;  %s54_s21 = sadd.s32 %s189_s4, %s51_s3  ;;  %s64_s22 = sadd.s32 %s190_s7, %s61_s5 }
  0x25   :  { %s75_s18 = scalar_lea.vmem [#allocation2], %s74_s11  ;;  %s86_s19 = scalar_lea.vmem [#allocation2], %s85_s15 }
  0x26   :  { %v76_v2 = vld [vmem:[%s75_s18] ss:$8 sm:$0x3]  ;;  %s55_s26 = scalar_lea.vmem [#allocation2], %s54_s21  ;;  %s65_s28 = scalar_lea.vmem [#allocation2], %s64_s22 }
  0x27   :  { %v87_v3 = vld [vmem:[%s86_s19] ss:$8 sm:$0x3]  ;;  %v77_v4 = vmax.f32 %v36_v0, %v76_v2  ;;  %s254_s5 = smov [#allocation6]  }
  0x28   :  { %v88_v5 = vmax.f32 %v46_v1, %v87_v3  ;;  %s90_s20 = sshra.s32 %s180_s16, 3  ;;  %s93_s23 = sand.u32 7, %s180_s16  ;;  %v56_v6 = vld [vmem:[%s55_s26] ss:$8 sm:$0x3] }
  0x29   :  { %s193_s24 = sshll.u32 %s90_s20, 4  ;;  %s101_s25 = sshra.s32 %s183_s17, 3  ;;  %v66_v8 = vld [vmem:[%s65_s28] ss:$8 sm:$0x3] }
  0x2a   :  { %s96_s1 = sadd.s32 %s193_s24, %s93_s23  ;;  %s104_s27 = sand.u32 7, %s183_s17  ;;  %v111_v7 = vmax.f32 %v77_v4, %v88_v5 }
  0x2b   :  { %s194_s29 = sshll.u32 %s101_s25, 4  ;;  %s97_s30 = scalar_lea.vmem [#allocation2], %s96_s1 }
  0x2c   :  { %v98_v9 = vld [vmem:[%s97_s30] ss:$8 sm:$0x3]  ;;  %s107_s3 = sadd.s32 %s194_s29, %s104_s27  ;;  %s125_s6 = sshll.u32 %s254_s5, 4  ;;  %s126_s6 = int_to_ptr.vmem [resolvable:$true] %s125_s6 }
  0x2d   :  { %v99_v11 = vmax.f32 %v56_v6, %v98_v9  ;;  %s108_s4 = scalar_lea.vmem [#allocation2], %s107_s3  ;;  %s226_s7 = scalar_lea.vmem %s126_s6, 32 }
  0x2e   :  { %v109_v12 = vld [vmem:[%s108_s4] ss:$8 sm:$0x3]  ;;  %p227_p5 = scmp.ne.s32.totalorder %s126_s6, %s226_s7  ;;  %p231_p6 = scmp.lt.s32.totalorder %s126_s6, %s126_s6 }
  0x2f   :  { %v110_v13 = vmax.f32 %v66_v8, %v109_v12  ;;  %v112_v14 = vmax.f32 %v111_v7, %v99_v11  ;;  %p232_p7 = scmp.lt.s32.totalorder %s226_s7, %s226_s7 }
  0x31   :  { %v113_v15 = vmax.f32 %v112_v14, %v110_v13  ;;  %p233_p8 = por %p232_p7, %p231_p6 }
  0x33   :  { %118 = vst.msk [vmem:[#allocation6] sm:$0x3] %vm116_vm0, %v113_v15  ;;  %p234_p9 = pnand %p233_p8, %p227_p5 }
  0x35   :  { %237 = shalt.err (!%p234_p9)
}
  0x36   :  { %128 = dma.vmem_to_hbm [thread:$0]  %s126_s6, 32, %s289_s2, [#allocation7]  }
  0x37   :  { %250 = dma.done.wait [#allocation7], 32  }
  0x38   :  { %251 = vsyncadd [#allocation7], 4294967264 }
  0x39   :  { %132 = vsyncpa [#allocation7], 1 }
  0x3a   :  { %133 = vsyncmov [#allocation3] }
  0x3d   :  { %s134_s10 = vpop.sfrf %133 }
  0x3e   :  { %p186_p10 = scmp.ne.s32.totalorder %s134_s10, 0 }
  0x40   :  { %138 = shalt.err (%p186_p10)  }

</bundles_post_ra>
